<compile_context>
chip_gen: v7x
topology: tpu7x:2x2x1
jax: 0.10.0
libtpu: 0.0.40
codegen_flags: <defaults>
</compile_context>

<pallas_src>
import math
import functools

import jax
import jax.numpy as jnp
from jax import lax
from jax.experimental import pallas as pl
from jax.experimental.pallas import tpu as pltpu


def _round_up(x: int, m: int) -> int:
    return ((x + m - 1) // m) * m


# ----------------------------------------------------------------------------
# Kernel: out = dropout(x + pe) on lane-dense (block_seq, B*E_pad) tiles
# ----------------------------------------------------------------------------
def _pos_enc_kernel(*refs, emb_pad, batch, apply_dropout, threshold, scale):
    if apply_dropout:
        x_ref, pe_ref, bits_ref, o_ref = refs
    else:
        x_ref, pe_ref, o_ref = refs
        bits_ref = None

    # Positional table for this block, loaded once and reused per batch stripe.
    pe = pe_ref[...].astype(jnp.float32)                     # (block_seq, E_pad)

    def stripe(start):
        xb = x_ref[:, pl.ds(start, emb_pad)].astype(jnp.float32)
        y = xb + pe
        if apply_dropout:
            bits = bits_ref[:, pl.ds(start, emb_pad)]        # uint32
            keep = bits >= jnp.uint32(threshold)             # P(keep) = 1 - p
            y = jnp.where(keep, y * jnp.float32(scale), 0.0)  # scale in f32
        o_ref[:, pl.ds(start, emb_pad)] = y.astype(o_ref.dtype)

    if batch <= 8:
        # Static unroll: each stripe is an independent, aligned read/add/store.
        for b in range(batch):
            stripe(b * emb_pad)
    else:
        def body(b, carry):
            stripe(pl.multiple_of(b * emb_pad, 128))
            return carry
        lax.fori_loop(0, batch, body, 0, unroll=True)


# ----------------------------------------------------------------------------
# Parameter setup (matches PositionalEncoding.__init__) -- plain JAX glue.
# ----------------------------------------------------------------------------
def make_pos_embedding(emb_size: int, maxlen: int = 5000) -> jnp.ndarray:
    den = jnp.exp(-jnp.arange(0, emb_size, 2, dtype=jnp.float32)
                  * (math.log(10000.0) / emb_size))
    pos = jnp.arange(0, maxlen, dtype=jnp.float32).reshape(maxlen, 1)
    pe = jnp.zeros((maxlen, emb_size), dtype=jnp.float32)
    pe = pe.at[:, 0::2].set(jnp.sin(pos * den))
    pe = pe.at[:, 1::2].set(jnp.cos(pos * den))
    return pe[:, None, :]  # (maxlen, 1, emb_size)


# ----------------------------------------------------------------------------
# Generation-aware tile target + block_seq selection
# ----------------------------------------------------------------------------
def _target_tile_bytes() -> int:
    try:
        kind = jax.devices()[0].device_kind.lower()
    except Exception:
        return 2 << 20
    if "v7" in kind or "7x" in kind:
        return 6 << 20      # ~3.2 TB/s HBM, but only 64 MiB VMEM/TC
    if "v6" in kind:
        return 4 << 20      # measured roofline gain from 2 -> 4 MiB tiles
    return 2 << 20          # v5e / unknown / CPU-interpret


def _choose_block_seq(seq_len: int, row_bytes: int, sub_mult: int) -> int:
    target = _target_tile_bytes()
    blk = (target // max(row_bytes, 1)) // sub_mult * sub_mult
    blk = max(blk, sub_mult)
    # Keep the grid at >= ~8 steps when the sequence allows it (pipeline depth,
    # and dual-TensorCore sharding of the "parallel" seq axis on v7x).
    per_step = _round_up(max(1, -(-seq_len // 8)), sub_mult)
    blk = min(blk, max(per_step, sub_mult))
    # Never bigger than the (padded) sequence itself.
    blk = min(blk, _round_up(seq_len, sub_mult))
    return blk


# ----------------------------------------------------------------------------
# Wrapper: pad to aligned shapes, pick tiles, launch the kernel
# ----------------------------------------------------------------------------
def positional_encoding(token_embedding: jnp.ndarray,
                        pos_embedding: jnp.ndarray,
                        *,
                        dropout_p: float = 0.1,
                        training: bool = False,
                        rng_key: jax.Array | None = None,
                        block_seq: int | None = None) -> jnp.ndarray:
    S, B, E = token_embedding.shape
    dtype = token_embedding.dtype
    itemsize = jnp.dtype(dtype).itemsize

    p = float(dropout_p)
    apply_dropout = bool(training) and p > 0.0
    if apply_dropout and p >= 1.0:
        return jnp.zeros_like(token_embedding)       # p == 1: everything dropped
    if apply_dropout and rng_key is None:
        rng_key = jax.random.PRNGKey(0)

    # ---- lane padding: E -> multiple of 128 (unmasked full-lane stores,
    #      128-aligned per-batch stripes inside the kernel) -------------------
    E_pad = _round_up(E, 128)
    pe2 = pos_embedding[:S, 0, :].astype(dtype)      # (S, E)
    x = token_embedding
    if E_pad != E:
        x = jnp.pad(x, ((0, 0), (0, 0), (0, E_pad - E)))
        pe2 = jnp.pad(pe2, ((0, 0), (0, E_pad - E)))

    # ---- tiling -------------------------------------------------------------
    sub_mult = 8 * max(1, 4 // itemsize)             # f32: 8, bf16: 16, int8: 32
    row_bytes = B * E_pad * itemsize
    if block_seq is None:
        block_seq = _choose_block_seq(S, row_bytes, sub_mult)

    # ---- sublane padding: S -> multiple of block_seq (no single huge block) -
    S_pad = _round_up(S, block_seq)
    if S_pad != S:
        x = jnp.pad(x, ((0, S_pad - S), (0, 0), (0, 0)))
        pe2 = jnp.pad(pe2, ((0, S_pad - S), (0, 0)))

    x2 = x.reshape(S_pad, B * E_pad)                 # lane-dense 2D view
    grid = (S_pad // block_seq,)

    kernel = functools.partial(
        _pos_enc_kernel,
        emb_pad=E_pad,
        batch=B,
        apply_dropout=apply_dropout,
        threshold=min(int(round(p * 2.0 ** 32)), 2 ** 32 - 1),
        scale=(1.0 / (1.0 - p)) if apply_dropout else 1.0,
    )

    in_specs = [
        pl.BlockSpec((block_seq, B * E_pad), lambda i: (i, 0)),
        pl.BlockSpec((block_seq, E_pad), lambda i: (i, 0)),
    ]
    operands = [x2, pe2]
    bits_blk_bytes = 0
    if apply_dropout:
        # Mask depends only on (rng_key, padded shape), not on the tiling.
        bits = jax.random.bits(rng_key, (S_pad, B * E_pad), dtype=jnp.uint32)
        in_specs.append(pl.BlockSpec((block_seq, B * E_pad), lambda i: (i, 0)))
        operands.append(bits)
        bits_blk_bytes = block_seq * B * E_pad * 4

    # VMEM budget: double-buffered inputs + double-buffered output + headroom.
    x_blk = block_seq * row_bytes
    pe_blk = block_seq * E_pad * itemsize
    vmem_limit = int(2 * (x_blk + pe_blk + bits_blk_bytes) + 2 * x_blk + (4 << 20))
    vmem_limit = max(min(vmem_limit, 56 << 20), 8 << 20)

    n_elem = S_pad * B * E_pad
    bytes_accessed = (2 * n_elem + S_pad * E_pad) * itemsize \
        + (4 * n_elem if apply_dropout else 0)
    cost = pl.CostEstimate(flops=n_elem * (3 if apply_dropout else 1),
                           transcendentals=0,
                           bytes_accessed=bytes_accessed)

    out2 = pl.pallas_call(
        kernel,
        out_shape=jax.ShapeDtypeStruct((S_pad, B * E_pad), dtype),
        grid=grid,
        in_specs=in_specs,
        out_specs=pl.BlockSpec((block_seq, B * E_pad), lambda i: (i, 0)),
        compiler_params=pltpu.CompilerParams(
            dimension_semantics=("parallel",),   # v7x shards seq across both TCs
            vmem_limit_bytes=vmem_limit,
        ),
        cost_estimate=cost,
    )(*operands)

    out = out2.reshape(S_pad, B, E_pad)
    return out[:S, :, :E]


if __name__ == "__main__":
    # Small shapes consistent with the module's forward pass.
    seq_len, batch, emb_size, maxlen = 8, 2, 32, 64
    dropout_p = 0.1

    key = jax.random.PRNGKey(0)
    k_x, k_drop = jax.random.split(key)
    token_embedding = jax.random.normal(k_x, (seq_len, batch, emb_size),
                                        dtype=jnp.float32)
    pos_embedding = make_pos_embedding(emb_size, maxlen)

    ref = token_embedding + pos_embedding[:seq_len]

    # Eval mode (dropout = identity): verify against the pure-JAX reference.
    out_eval = positional_encoding(token_embedding, pos_embedding,
                                   dropout_p=dropout_p, training=False)
    out_eval = jax.block_until_ready(out_eval)
    assert out_eval.shape == (seq_len, batch, emb_size)
    assert jnp.allclose(out_eval, ref, atol=1e-6), "eval-mode mismatch vs reference"

    # Training mode (dropout active).
    out_train = positional_encoding(token_embedding, pos_embedding,
                                    dropout_p=dropout_p, training=True,
                                    rng_key=k_drop)
    out_train = jax.block_until_ready(out_train)
    assert out_train.shape == (seq_len, batch, emb_size)
    assert bool(jnp.all(jnp.isfinite(out_train)))
    # Surviving (non-zero) entries must equal ref / (1 - p); dropped entries are 0.
    kept = out_train != 0
    assert jnp.allclose(jnp.where(kept, out_train * (1.0 - dropout_p), 0.0),
                        jnp.where(kept, ref, 0.0), atol=1e-5, rtol=1e-5), \
        "training-mode surviving values don't match inverted-dropout scaling"

    print("KERNEL_OK")
</pallas_src>

<mosaic_0001>
module attributes {stable_mosaic.version = 11 : i64} {
  func.func @_pos_enc_kernel(%arg0: i32, %arg1: memref<8x256xf32, #tpu.memory_space<vmem>>, %arg2: memref<8x128xf32, #tpu.memory_space<vmem>>, %arg3: memref<8x256xf32, #tpu.memory_space<vmem>>) attributes {dimension_semantics = [#tpu.dimension_semantics<parallel>], iteration_bounds = array<i64: 1>, scalar_prefetch = 0 : i64, scratch_operands = 0 : i64, tpu.core_type = #tpu.core_type<tc>, window_params = [{transform_indices = @transform_0, window_bounds = array<i64: 8, 256>}, {transform_indices = @transform_1, window_bounds = array<i64: 8, 128>}, {transform_indices = @transform_2, window_bounds = array<i64: 8, 256>}]} {
    %c0 = arith.constant 0 : index
    %c0_0 = arith.constant 0 : index
    %0 = vector.load %arg2[%c0, %c0_0] : memref<8x128xf32, #tpu.memory_space<vmem>>, vector<8x128xf32>
    %c0_1 = arith.constant 0 : index
    %c0_2 = arith.constant 0 : index
    %1 = vector.load %arg1[%c0_1, %c0_2] : memref<8x256xf32, #tpu.memory_space<vmem>>, vector<8x128xf32>
    %2 = arith.addf %1, %0 : vector<8x128xf32>
    %c0_3 = arith.constant 0 : index
    %c0_4 = arith.constant 0 : index
    %3 = vector.load %arg3[%c0_3, %c0_4] : memref<8x256xf32, #tpu.memory_space<vmem>>, vector<8x128xf32>
    tpu.vector_store %arg3[%c0_3, %c0_4], %2 {strides = array<i32>} : memref<8x256xf32, #tpu.memory_space<vmem>>, vector<8x128xf32>,
    %c0_5 = arith.constant 0 : index
    %c128 = arith.constant 128 : index
    %4 = vector.load %arg1[%c0_5, %c128] : memref<8x256xf32, #tpu.memory_space<vmem>>, vector<8x128xf32>
    %5 = arith.addf %4, %0 : vector<8x128xf32>
    %c0_6 = arith.constant 0 : index
    %c128_7 = arith.constant 128 : index
    %6 = vector.load %arg3[%c0_6, %c128_7] : memref<8x256xf32, #tpu.memory_space<vmem>>, vector<8x128xf32>
    tpu.vector_store %arg3[%c0_6, %c128_7], %5 {strides = array<i32>} : memref<8x256xf32, #tpu.memory_space<vmem>>, vector<8x128xf32>,
    return
  }
  func.func @transform_0(%arg0: i32) -> (i32, i32) {
    %c0_i32 = arith.constant 0 : i32
    %c0_i32_0 = arith.constant 0 : i32
    return %arg0, %c0_i32 : i32, i32
  }
  func.func @transform_1(%arg0: i32) -> (i32, i32) {
    %c0_i32 = arith.constant 0 : i32
    %c0_i32_0 = arith.constant 0 : i32
    return %arg0, %c0_i32 : i32, i32
  }
  func.func @transform_2(%arg0: i32) -> (i32, i32) {
    %c0_i32 = arith.constant 0 : i32
    %c0_i32_0 = arith.constant 0 : i32
    return %arg0, %c0_i32 : i32, i32
  }
}

</mosaic_0001>

<bundles_post_ra>
// kernel: tpu_custom_call.1
= control target key start
LH: loop header
LB: loop body
LE: loop exit
PB: predicated region body
PF: predicated region fallthrough
CT: control target
= control target key end

     0   :  { %7 = vsyncpa [#allocation3], 0  ;;  %s188_s0 = inlined_call_operand.hbm [shape: f32[8,256], index: 0, kind: input, shape index: {}]   ;;  %s189_s1 = inlined_call_operand.hbm [shape: f32[8,128], index: 1, kind: input, shape index: {}]   ;;  %s190_s2 = inlined_call_operand.hbm [shape: f32[8,256], index: 2, kind: output, shape index: {}]  }
   0x1   :  { %8 = vsyncpa [#allocation6], 0 }
   0x2   :  { %9 = vsyncpa [#allocation4], 0  ;;  %s134_s9 = smov [#allocation2]   ;;  %s135_s11 = smov [#allocation5]  }
   0x3   :  { %s16_s10 = sshll.u32 %s134_s9, 4  ;;  %s26_s12 = sshll.u32 %s135_s11, 4  ;;  %s17_s10 = int_to_ptr.vmem [resolvable:$true] %s16_s10  ;;  %s27_s12 = int_to_ptr.vmem [resolvable:$true] %s26_s12 }
   0x4   :  { %s62_s15 = scalar_lea.hbm %s188_s0, 256 }
   0x5   :  { %p63_p0 = scmp.ne.s32.totalorder %s188_s0, %s62_s15  ;;  %p66_p1 = scmp.lt.u32.totalorder %s62_s15, %s188_s0 }
   0x7   :  { %p68_p2 = pnand %p66_p1, %p63_p0 }
   0x9   :  { %71 = shalt.err (!%p68_p2)
}
   0xa   :  { %s72_s20 = scalar_lea.vmem %s17_s10, 256  ;;  %p77_p4 = scmp.lt.s32.totalorder %s17_s10, %s17_s10 }
   0xb   :  { %p73_p3 = scmp.ne.s32.totalorder %s17_s10, %s72_s20  ;;  %p78_p5 = scmp.lt.s32.totalorder %s72_s20, %s72_s20 }
   0xd   :  { %p79_p6 = por %p78_p5, %p77_p4 }
   0xf   :  { %p80_p7 = pnand %p79_p6, %p73_p3 }
  0x11   :  { %83 = shalt.err (!%p80_p7)
}
  0x12   :  { %19 = dma.hbm_to_vmem [thread:$0]  %s188_s0, 256, %s17_s10, [#allocation3]  }
  0x13   :  { %s84_s25 = scalar_lea.hbm %s189_s1, 128 }
  0x14   :  { %p85_p8 = scmp.ne.s32.totalorder %s189_s1, %s84_s25  ;;  %p88_p9 = scmp.lt.u32.totalorder %s84_s25, %s189_s1 }
  0x16   :  { %p90_p10 = pnand %p88_p9, %p85_p8 }
  0x18   :  { %93 = shalt.err (!%p90_p10)
}
  0x19   :  { %s94_s30 = scalar_lea.vmem %s27_s12, 128  ;;  %p99_p12 = scmp.lt.s32.totalorder %s27_s12, %s27_s12 }
  0x1a   :  { %p95_p11 = scmp.ne.s32.totalorder %s27_s12, %s94_s30  ;;  %p100_p13 = scmp.lt.s32.totalorder %s94_s30, %s94_s30 }
  0x1c   :  { %p101_p0 = por %p100_p13, %p99_p12 }
  0x1e   :  { %p102_p1 = pnand %p101_p0, %p95_p11 }
  0x20   :  { %105 = shalt.err (!%p102_p1)
}
  0x21   :  { %29 = dma.hbm_to_vmem [thread:$0]  %s189_s1, 128, %s27_s12, [#allocation6]  }
  0x22   :  { %128 = dma.done.wait [#allocation3], 256  }
  0x23   :  { %129 = vsyncadd [#allocation3], 4294967040 }
  0x24   :  { %130 = dma.done.wait [#allocation6], 128  }
  0x25   :  { %131 = vsyncadd [#allocation6], 4294967168  ;;  %s136_s4 = smov [#allocation7]   ;;  %v36_v0 = vld [vmem:[#allocation5] sm:$0xff]  ;;  %v37_v1 = vld [vmem:[#allocation2] sm:$0xff] }
  0x26   :  { %s49_s5 = sshll.u32 %s136_s4, 4  ;;  %v40_v2 = vld [vmem:[#allocation2 + $0x8] sm:$0xff]  ;;  %v38_v3 = vadd.f32 %v37_v1, %v36_v0  ;;  %s50_s5 = int_to_ptr.vmem [resolvable:$true] %s49_s5 }
  0x27   :  { %v41_v4 = vadd.f32 %v40_v2, %v36_v0  ;;  %s106_s6 = scalar_lea.vmem %s50_s5, 256  ;;  %p111_p3 = scmp.lt.s32.totalorder %s50_s5, %s50_s5 }
  0x28   :  { %39 = vst [vmem:[#allocation7] sm:$0xff] %v38_v3  ;;  %p107_p2 = scmp.ne.s32.totalorder %s50_s5, %s106_s6  ;;  %p112_p4 = scmp.lt.s32.totalorder %s106_s6, %s106_s6 }
  0x29   :  { %42 = vst [vmem:[#allocation7 + $0x8] sm:$0xff] %v41_v4 }
  0x2a   :  { %p113_p5 = por %p112_p4, %p111_p3 }
  0x2c   :  { %p114_p6 = pnand %p113_p5, %p107_p2 }
  0x2e   :  { %117 = shalt.err (!%p114_p6)
}
  0x2f   :  { %s118_s8 = scalar_lea.hbm %s190_s2, 256 }
  0x30   :  { %p119_p7 = scmp.ne.s32.totalorder %s190_s2, %s118_s8  ;;  %p122_p8 = scmp.lt.u32.totalorder %s118_s8, %s190_s2 }
  0x32   :  { %p124_p9 = pnand %p122_p8, %p119_p7 }
  0x34   :  { %127 = shalt.err (!%p124_p9)
}
  0x35   :  { %52 = dma.vmem_to_hbm [thread:$0]  %s50_s5, 256, %s190_s2, [#allocation4]  }
  0x36   :  { %132 = dma.done.wait [#allocation4], 256  }
  0x37   :  { %133 = vsyncadd [#allocation4], 4294967040 }
  0x38   :  { %56 = vsyncpa [#allocation3], 1 }
  0x39   :  { %57 = vsyncpa [#allocation6], 1 }
  0x3a   :  { %58 = vsyncpa [#allocation4], 1 }

</bundles_post_ra>
